<compile_context>
chip_gen: v6e
topology: v6e:2x2x1
jax: 0.10.0
libtpu: 0.0.40
codegen_flags: <defaults>
</compile_context>

<pallas_src>
import functools

import jax
import jax.numpy as jnp
from jax import lax
from jax.experimental import pallas as pl
from jax.experimental.pallas import tpu as pltpu


# ---------------------------------------------------------------------------
# Tiling / VMEM helpers
# ---------------------------------------------------------------------------
def _pick_tile(dim, target, align):
    """Largest tile <= target that divides `dim` and is a multiple of `align`.

    If dim <= target we use the full dim (always legal for a BlockSpec).  If no
    aligned divisor exists we also fall back to the full dim.
    TODO(synk): pad the array to an aligned tile instead of falling back.
    """
    if dim <= target:
        return dim
    t = (target // align) * align
    while t >= align:
        if dim % t == 0:
            return t
        t -= align
    return dim


def _vmem_limit(block_bytes):
    """Scoped-VMEM request: double-buffered blocks + headroom for f32 temps.

    Capped at 64 MiB (v7x physical VMEM); floor of 16 MiB (v5e default scope).
    """
    return int(min(max(4 * block_bytes + (8 << 20), 16 << 20), 64 << 20))


# ---------------------------------------------------------------------------
# Tiled linear projection:  y = x @ W + b
# ---------------------------------------------------------------------------
def _linear_kernel(x_ref, w_ref, b_ref, o_ref, acc_ref):
    @pl.when(pl.program_id(2) == 0)
    def _():
        acc_ref[...] = jnp.zeros_like(acc_ref)

    acc_ref[...] += jnp.dot(
        x_ref[...], w_ref[...], preferred_element_type=jnp.float32
    )

    @pl.when(pl.program_id(2) == pl.num_programs(2) - 1)
    def _():
        o_ref[...] = (acc_ref[...] + b_ref[...].astype(jnp.float32)).astype(o_ref.dtype)


def linear(x2d, w, b, *, tm=512, tn=512, tk=1024):
    M, K = x2d.shape
    K2, N = w.shape
    assert K == K2
    tm = _pick_tile(M, tm, 8)      # sublane-aligned
    tn = _pick_tile(N, tn, 128)    # lane / MXU aligned
    tk = _pick_tile(K, tk, 128)
    grid = (M // tm, N // tn, K // tk)

    itemsize = jnp.dtype(x2d.dtype).itemsize
    block_bytes = (tm * tk + tk * tn + tn + tm * tn) * itemsize + tm * tn * 4
    cost = pl.CostEstimate(
        flops=2 * M * N * K + M * N,
        transcendentals=0,
        bytes_accessed=(M * K + K * N + M * N + N) * itemsize,
    )

    return pl.pallas_call(
        _linear_kernel,
        out_shape=jax.ShapeDtypeStruct((M, N), x2d.dtype),
        grid_spec=pltpu.PrefetchScalarGridSpec(
            num_scalar_prefetch=0,
            grid=grid,
            in_specs=[
                pl.BlockSpec((tm, tk), lambda i, j, k: (i, k)),
                pl.BlockSpec((tk, tn), lambda i, j, k: (k, j)),
                pl.BlockSpec((1, tn), lambda i, j, k: (0, j)),
            ],
            out_specs=pl.BlockSpec((tm, tn), lambda i, j, k: (i, j)),
            scratch_shapes=[pltpu.VMEM((tm, tn), jnp.float32)],
        ),
        compiler_params=pltpu.CompilerParams(
            dimension_semantics=("parallel", "parallel", "arbitrary"),
            vmem_limit_bytes=_vmem_limit(block_bytes),
        ),
        cost_estimate=cost,
    )(x2d, w, b.reshape(1, N))


# ---------------------------------------------------------------------------
# Attention core.
#   grid = (B, S // tq).  One grid step processes ALL heads for one query tile.
#   Input : qkv (B*S, 3E)  — the batch's (S, 3E) rows are resident across the
#           query-tile axis (index_map ignores i), heads are static lane slices.
#   Output: attn (B, H, S, S) in input dtype, ctx (B*S, E) lane-dense merged heads.
# ---------------------------------------------------------------------------
def attention_core(qkv, batch, seq, embed, num_heads, *, tq_target=128):
    B, S, E, H = batch, seq, embed, num_heads
    D = E // H
    dtype = qkv.dtype

    tq = _pick_tile(S, tq_target, 8)
    nq = S // tq

    def kernel(qkv_ref, attn_ref, ctx_ref):
        i = pl.program_id(1)
        row0 = pl.multiple_of(i * tq, tq)          # sublane-aligned dynamic row offset
        ctx_parts = []
        for h in range(H):                         # static unroll over heads
            # 1/sqrt(D) already folded into Wq/bq -> no in-kernel scaling.
            q = qkv_ref[pl.ds(row0, tq), pl.ds(h * D, D)]        # (tq, D)
            k = qkv_ref[:, pl.ds(E + h * D, D)]                  # (S, D)
            v = qkv_ref[:, pl.ds(2 * E + h * D, D)]              # (S, D)

            # Contract head_dim with head_dim directly: no k.T / XLU transpose.
            s = lax.dot_general(
                q, k,
                dimension_numbers=(((1,), (1,)), ((), ())),
                preferred_element_type=jnp.float32,
            )                                                    # (tq, S) f32

            m = jnp.max(s, axis=-1, keepdims=True)
            p = jnp.exp(s - m)
            denom = jnp.sum(p, axis=-1, keepdims=True)
            # Exact reciprocal: attn is a user-visible output (torch.softmax parity).
            attn = p * pl.reciprocal(denom, approx=False)

            attn_ref[0, h, :, :] = attn.astype(attn_ref.dtype)
            ctx_parts.append(
                jnp.dot(attn.astype(dtype), v, preferred_element_type=jnp.float32)
            )
        # Single lane-dense (tq, E) store; feeds the output projection directly.
        ctx_ref[...] = jnp.concatenate(ctx_parts, axis=-1).astype(ctx_ref.dtype)

    itemsize = jnp.dtype(dtype).itemsize
    block_bytes = (S * 3 * E + H * tq * S + tq * E) * itemsize
    cost = pl.CostEstimate(
        flops=4 * B * H * S * S * D + 6 * B * H * S * S,
        transcendentals=B * H * S * S,
        bytes_accessed=(B * S * 3 * E + B * H * S * S + B * S * E) * itemsize,
    )

    attn, ctx = pl.pallas_call(
        kernel,
        out_shape=(
            jax.ShapeDtypeStruct((B, H, S, S), dtype),   # attention weights
            jax.ShapeDtypeStruct((B * S, E), dtype),     # merged-head context
        ),
        grid=(B, nq),
        in_specs=[pl.BlockSpec((S, 3 * E), lambda b, i: (b, 0))],
        out_specs=(
            pl.BlockSpec((1, H, tq, S), lambda b, i: (b, 0, i, 0)),
            pl.BlockSpec((tq, E), lambda b, i: (b * nq + i, 0)),
        ),
        compiler_params=pltpu.CompilerParams(
            # Megacore split on batch only; keeps the resident QKV block reused
            # across query tiles instead of being re-DMA'd by both cores.
            dimension_semantics=("parallel", "arbitrary"),
            vmem_limit_bytes=_vmem_limit(block_bytes),
        ),
        cost_estimate=cost,
    )(qkv)
    return attn, ctx


# ---------------------------------------------------------------------------
# Parameter preparation (done ONCE per model, not per forward)
# ---------------------------------------------------------------------------
def prepare_mha_params(params, num_heads):
    embed = params["wq"].shape[0]
    dim_per_head = embed // num_heads
    scale = 1.0 / jnp.sqrt(jnp.float32(dim_per_head))
    # Fused QKV weight/bias with 1/sqrt(D) folded into the Q columns.
    w_qkv = jnp.concatenate(
        [params["wq"] * scale, params["wk"], params["wv"]], axis=1)   # (E, 3E)
    b_qkv = jnp.concatenate(
        [params["bq"] * scale, params["bk"], params["bv"]], axis=0)   # (3E,)
    return {"w_qkv": w_qkv, "b_qkv": b_qkv, "wo": params["wo"], "bo": params["bo"]}


# ---------------------------------------------------------------------------
# Full forward pass (no XLA transposes anywhere; only free contiguous reshapes)
# ---------------------------------------------------------------------------
@functools.partial(jax.jit, static_argnums=2)
def multi_head_attention_forward(x, prepared, num_heads):
    B, S, E = x.shape
    x2d = x.reshape(B * S, E)                                       # free reshape
    qkv = linear(x2d, prepared["w_qkv"], prepared["b_qkv"])         # (B*S, 3E)
    attn, ctx2d = attention_core(qkv, B, S, E, num_heads)           # (B,H,S,S), (B*S,E)
    out = linear(ctx2d, prepared["wo"], prepared["bo"]).reshape(B, S, E)
    return out, attn


# ---------------------------------------------------------------------------
# Pure-JAX reference (mirrors the PyTorch forward) for a correctness check.
# ---------------------------------------------------------------------------
def reference_forward(x, params, num_heads):
    B, S, E = x.shape
    D = E // num_heads
    q = (x @ params["wq"] + params["bq"]).reshape(B, S, num_heads, D).transpose(0, 2, 1, 3)
    k = (x @ params["wk"] + params["bk"]).reshape(B, S, num_heads, D).transpose(0, 2, 1, 3)
    v = (x @ params["wv"] + params["bv"]).reshape(B, S, num_heads, D).transpose(0, 2, 1, 3)
    scores = jnp.einsum("bhqd,bhkd->bhqk", q, k) / jnp.sqrt(jnp.float32(D))
    attn = jax.nn.softmax(scores, axis=-1)
    ctx = jnp.einsum("bhqk,bhkd->bhqd", attn, v).transpose(0, 2, 1, 3).reshape(B, S, E)
    out = ctx @ params["wo"] + params["bo"]
    return out, attn


def init_params(key, embedding_dim):
    # Deterministic init; weights stored transposed (E_in, E_out) so y = x @ W + b.
    keys = jax.random.split(key, 8)
    scale = 1.0 / jnp.sqrt(jnp.float32(embedding_dim))

    def w(k):
        return jax.random.uniform(k, (embedding_dim, embedding_dim),
                                  jnp.float32, -scale, scale)

    def b(k):
        return jax.random.uniform(k, (embedding_dim,), jnp.float32, -scale, scale)

    return {
        "wq": w(keys[0]), "bq": b(keys[1]),
        "wk": w(keys[2]), "bk": b(keys[3]),
        "wv": w(keys[4]), "bv": b(keys[5]),
        "wo": w(keys[6]), "bo": b(keys[7]),
    }


if __name__ == "__main__":
    batch, seq_len, embedding_dim = 2, 8, 32
    num_heads = 4

    key = jax.random.PRNGKey(0)
    kx, kp = jax.random.split(key)
    x = jax.random.normal(kx, (batch, seq_len, embedding_dim), jnp.float32)
    params = init_params(kp, embedding_dim)
    prepared = prepare_mha_params(params, num_heads)      # built once, reused per call

    out, attn = multi_head_attention_forward(x, prepared, num_heads)
    out = jax.block_until_ready(out)
    attn = jax.block_until_ready(attn)

    out_ref, attn_ref = reference_forward(x, params, num_heads)
    assert out.shape == (batch, seq_len, embedding_dim)
    assert attn.shape == (batch, num_heads, seq_len, seq_len)
    # f32 end-to-end, exact softmax normalization; tolerance covers MXU/XLA
    # accumulation-order differences and the scale folded into Wq.
    assert jnp.allclose(out, out_ref, atol=2e-4, rtol=2e-4), (
        float(jnp.max(jnp.abs(out - out_ref))))
    assert jnp.allclose(attn, attn_ref, atol=2e-4, rtol=2e-4), (
        float(jnp.max(jnp.abs(attn - attn_ref))))

    print("KERNEL_OK")
</pallas_src>

<mosaic_0001>
module attributes {stable_mosaic.version = 11 : i64} {
  func.func @_linear_kernel(%arg0: i32, %arg1: i32, %arg2: i32, %arg3: memref<16x32xf32, #tpu.memory_space<vmem>>, %arg4: memref<32x96xf32, #tpu.memory_space<vmem>>, %arg5: memref<1x96xf32, #tpu.memory_space<vmem>>, %arg6: memref<16x96xf32, #tpu.memory_space<vmem>>, %arg7: memref<16x96xf32, #tpu.memory_space<vmem>>) attributes {dimension_semantics = [#tpu.dimension_semantics<parallel>, #tpu.dimension_semantics<parallel>, #tpu.dimension_semantics<arbitrary>], iteration_bounds = array<i64: 1, 1, 1>, scalar_prefetch = 0 : i64, scratch_operands = 1 : i64, tpu.core_type = #tpu.core_type<tc>, window_params = [{transform_indices = @transform_0, window_bounds = array<i64: 16, 32>}, {transform_indices = @transform_1, window_bounds = array<i64: 32, 96>}, {transform_indices = @transform_2, window_bounds = array<i64: 1, 96>}, {transform_indices = @transform_3, window_bounds = array<i64: 16, 96>}]} {
    %c0_i32 = arith.constant 0 : i32
    %0 = arith.cmpi eq, %arg2, %c0_i32 : i32
    %1 = arith.extui %0 : i1 to i32
    %c0_i32_0 = arith.constant 0 : i32
    %2 = arith.cmpi ne, %1, %c0_i32_0 : i32
    scf.if %2 {
      %cst_10 = arith.constant 0.000000e+00 : f32
      %12 = vector.broadcast %cst_10 : f32 to vector<16x96xf32>
      %c0_11 = arith.constant 0 : index
      %c0_12 = arith.constant 0 : index
      %13 = vector.load %arg7[%c0_11, %c0_12] : memref<16x96xf32, #tpu.memory_space<vmem>>, vector<16x96xf32>
      tpu.vector_store %arg7[%c0_11, %c0_12], %12 {strides = array<i32>} : memref<16x96xf32, #tpu.memory_space<vmem>>, vector<16x96xf32>,
    } else {
    }
    %c0 = arith.constant 0 : index
    %c0_1 = arith.constant 0 : index
    %3 = vector.load %arg7[%c0, %c0_1] : memref<16x96xf32, #tpu.memory_space<vmem>>, vector<16x96xf32>
    %c0_2 = arith.constant 0 : index
    %c0_3 = arith.constant 0 : index
    %4 = vector.load %arg3[%c0_2, %c0_3] : memref<16x32xf32, #tpu.memory_space<vmem>>, vector<16x32xf32>
    %c0_4 = arith.constant 0 : index
    %c0_5 = arith.constant 0 : index
    %5 = vector.load %arg4[%c0_4, %c0_5] : memref<32x96xf32, #tpu.memory_space<vmem>>, vector<32x96xf32>
    %cst = arith.constant dense<0.000000e+00> : vector<16x96xf32>
    %6 = tpu.matmul %4, %5, %cst {dimension_numbers = #tpu.dot_dimension_numbers<[1], [0], [0], [1], [0, 0, 1, 1], [], []>} : vector<16x32xf32>, vector<32x96xf32>, vector<16x96xf32> -> vector<16x96xf32>
    %7 = arith.addf %3, %6 : vector<16x96xf32>
    %c0_6 = arith.constant 0 : index
    %c0_7 = arith.constant 0 : index
    %8 = vector.load %arg7[%c0_6, %c0_7] : memref<16x96xf32, #tpu.memory_space<vmem>>, vector<16x96xf32>
    tpu.vector_store %arg7[%c0_6, %c0_7], %7 {strides = array<i32>} : memref<16x96xf32, #tpu.memory_space<vmem>>, vector<16x96xf32>,
    %c0_i32_8 = arith.constant 0 : i32
    %9 = arith.cmpi eq, %arg2, %c0_i32_8 : i32
    %10 = arith.extui %9 : i1 to i32
    %c0_i32_9 = arith.constant 0 : i32
    %11 = arith.cmpi ne, %10, %c0_i32_9 : i32
    scf.if %11 {
      %c0_10 = arith.constant 0 : index
      %c0_11 = arith.constant 0 : index
      %12 = vector.load %arg7[%c0_10, %c0_11] : memref<16x96xf32, #tpu.memory_space<vmem>>, vector<16x96xf32>
      %c0_12 = arith.constant 0 : index
      %c0_13 = arith.constant 0 : index
      %13 = vector.load %arg5[%c0_12, %c0_13] : memref<1x96xf32, #tpu.memory_space<vmem>>, vector<1x96xf32>
      %14 = vector.broadcast %13 : vector<1x96xf32> to vector<16x96xf32>
      %15 = arith.addf %12, %14 : vector<16x96xf32>
      %c0_14 = arith.constant 0 : index
      %c0_15 = arith.constant 0 : index
      %16 = vector.load %arg6[%c0_14, %c0_15] : memref<16x96xf32, #tpu.memory_space<vmem>>, vector<16x96xf32>
      tpu.vector_store %arg6[%c0_14, %c0_15], %15 {strides = array<i32>} : memref<16x96xf32, #tpu.memory_space<vmem>>, vector<16x96xf32>,
    } else {
    }
    return
  }
  func.func @transform_0(%arg0: i32, %arg1: i32, %arg2: i32) -> (i32, i32) {
    %c0_i32 = arith.constant 0 : i32
    return %arg0, %arg2 : i32, i32
  }
  func.func @transform_1(%arg0: i32, %arg1: i32, %arg2: i32) -> (i32, i32) {
    %c0_i32 = arith.constant 0 : i32
    return %arg2, %arg1 : i32, i32
  }
  func.func @transform_2(%arg0: i32, %arg1: i32, %arg2: i32) -> (i32, i32) {
    %c0_i32 = arith.constant 0 : i32
    %c0_i32_0 = arith.constant 0 : i32
    return %c0_i32, %arg1 : i32, i32
  }
  func.func @transform_3(%arg0: i32, %arg1: i32, %arg2: i32) -> (i32, i32) {
    %c0_i32 = arith.constant 0 : i32
    return %arg0, %arg1 : i32, i32
  }
}

module attributes {stable_mosaic.version = 11 : i64} {
  func.func @_linear_kernel(%arg0: i32, %arg1: i32, %arg2: i32, %arg3: memref<16x32xf32, #tpu.memory_space<vmem>>, %arg4: memref<32x32xf32, #tpu.memory_space<vmem>>, %arg5: memref<1x32xf32, #tpu.memory_space<vmem>>, %arg6: memref<16x32xf32, #tpu.memory_space<vmem>>, %arg7: memref<16x32xf32, #tpu.memory_space<vmem>>) attributes {dimension_semantics = [#tpu.dimension_semantics<parallel>, #tpu.dimension_semantics<parallel>, #tpu.dimension_semantics<arbitrary>], iteration_bounds = array<i64: 1, 1, 1>, scalar_prefetch = 0 : i64, scratch_operands = 1 : i64, tpu.core_type = #tpu.core_type<tc>, window_params = [{transform_indices = @transform_0, window_bounds = array<i64: 16, 32>}, {transform_indices = @transform_1, window_bounds = array<i64: 32, 32>}, {transform_indices = @transform_2, window_bounds = array<i64: 1, 32>}, {transform_indices = @transform_3, window_bounds = array<i64: 16, 32>}]} {
    %c0_i32 = arith.constant 0 : i32
    %0 = arith.cmpi eq, %arg2, %c0_i32 : i32
    %1 = arith.extui %0 : i1 to i32
    %c0_i32_0 = arith.constant 0 : i32
    %2 = arith.cmpi ne, %1, %c0_i32_0 : i32
    scf.if %2 {
      %cst_10 = arith.constant 0.000000e+00 : f32
      %12 = vector.broadcast %cst_10 : f32 to vector<16x32xf32>
      %c0_11 = arith.constant 0 : index
      %c0_12 = arith.constant 0 : index
      %13 = vector.load %arg7[%c0_11, %c0_12] : memref<16x32xf32, #tpu.memory_space<vmem>>, vector<16x32xf32>
      tpu.vector_store %arg7[%c0_11, %c0_12], %12 {strides = array<i32>} : memref<16x32xf32, #tpu.memory_space<vmem>>, vector<16x32xf32>,
    } else {
    }
    %c0 = arith.constant 0 : index
    %c0_1 = arith.constant 0 : index
    %3 = vector.load %arg7[%c0, %c0_1] : memref<16x32xf32, #tpu.memory_space<vmem>>, vector<16x32xf32>
    %c0_2 = arith.constant 0 : index
    %c0_3 = arith.constant 0 : index
    %4 = vector.load %arg3[%c0_2, %c0_3] : memref<16x32xf32, #tpu.memory_space<vmem>>, vector<16x32xf32>
    %c0_4 = arith.constant 0 : index
    %c0_5 = arith.constant 0 : index
    %5 = vector.load %arg4[%c0_4, %c0_5] : memref<32x32xf32, #tpu.memory_space<vmem>>, vector<32x32xf32>
    %cst = arith.constant dense<0.000000e+00> : vector<16x32xf32>
    %6 = tpu.matmul %4, %5, %cst {dimension_numbers = #tpu.dot_dimension_numbers<[1], [0], [0], [1], [0, 0, 1, 1], [], []>} : vector<16x32xf32>, vector<32x32xf32>, vector<16x32xf32> -> vector<16x32xf32>
    %7 = arith.addf %3, %6 : vector<16x32xf32>
    %c0_6 = arith.constant 0 : index
    %c0_7 = arith.constant 0 : index
    %8 = vector.load %arg7[%c0_6, %c0_7] : memref<16x32xf32, #tpu.memory_space<vmem>>, vector<16x32xf32>
    tpu.vector_store %arg7[%c0_6, %c0_7], %7 {strides = array<i32>} : memref<16x32xf32, #tpu.memory_space<vmem>>, vector<16x32xf32>,
    %c0_i32_8 = arith.constant 0 : i32
    %9 = arith.cmpi eq, %arg2, %c0_i32_8 : i32
    %10 = arith.extui %9 : i1 to i32
    %c0_i32_9 = arith.constant 0 : i32
    %11 = arith.cmpi ne, %10, %c0_i32_9 : i32
    scf.if %11 {
      %c0_10 = arith.constant 0 : index
      %c0_11 = arith.constant 0 : index
      %12 = vector.load %arg7[%c0_10, %c0_11] : memref<16x32xf32, #tpu.memory_space<vmem>>, vector<16x32xf32>
      %c0_12 = arith.constant 0 : index
      %c0_13 = arith.constant 0 : index
      %13 = vector.load %arg5[%c0_12, %c0_13] : memref<1x32xf32, #tpu.memory_space<vmem>>, vector<1x32xf32>
      %14 = vector.broadcast %13 : vector<1x32xf32> to vector<16x32xf32>
      %15 = arith.addf %12, %14 : vector<16x32xf32>
      %c0_14 = arith.constant 0 : index
      %c0_15 = arith.constant 0 : index
      %16 = vector.load %arg6[%c0_14, %c0_15] : memref<16x32xf32, #tpu.memory_space<vmem>>, vector<16x32xf32>
      tpu.vector_store %arg6[%c0_14, %c0_15], %15 {strides = array<i32>} : memref<16x32xf32, #tpu.memory_space<vmem>>, vector<16x32xf32>,
    } else {
    }
    return
  }
  func.func @transform_0(%arg0: i32, %arg1: i32, %arg2: i32) -> (i32, i32) {
    %c0_i32 = arith.constant 0 : i32
    return %arg0, %arg2 : i32, i32
  }
  func.func @transform_1(%arg0: i32, %arg1: i32, %arg2: i32) -> (i32, i32) {
    %c0_i32 = arith.constant 0 : i32
    return %arg2, %arg1 : i32, i32
  }
  func.func @transform_2(%arg0: i32, %arg1: i32, %arg2: i32) -> (i32, i32) {
    %c0_i32 = arith.constant 0 : i32
    %c0_i32_0 = arith.constant 0 : i32
    return %c0_i32, %arg1 : i32, i32
  }
  func.func @transform_3(%arg0: i32, %arg1: i32, %arg2: i32) -> (i32, i32) {
    %c0_i32 = arith.constant 0 : i32
    return %arg0, %arg1 : i32, i32
  }
}

module attributes {stable_mosaic.version = 11 : i64} {
  func.func @kernel(%arg0: i32, %arg1: i32, %arg2: memref<8x96xf32, #tpu.memory_space<vmem>>, %arg3: memref<1x4x8x8xf32, #tpu.memory_space<vmem>>, %arg4: memref<8x32xf32, #tpu.memory_space<vmem>>) attributes {dimension_semantics = [#tpu.dimension_semantics<parallel>, #tpu.dimension_semantics<arbitrary>], iteration_bounds = array<i64: 2, 1>, scalar_prefetch = 0 : i64, scratch_operands = 0 : i64, tpu.core_type = #tpu.core_type<tc>, window_params = [{transform_indices = @transform_0, window_bounds = array<i64: 8, 96>}, {transform_indices = @transform_1, window_bounds = array<i64: 1, 4, 8, 8>}, {transform_indices = @transform_2, window_bounds = array<i64: 8, 32>}]} {
    %c8_i32 = arith.constant 8 : i32
    %0 = arith.muli %arg1, %c8_i32 : i32
    %1 = tpu.assume_multiple %0, 8 : i32
    %2 = arith.index_cast %1 : i32 to index
    %c0 = arith.constant 0 : index
    %3 = vector.load %arg2[%2, %c0] : memref<8x96xf32, #tpu.memory_space<vmem>>, vector<8x8xf32>
    %c0_0 = arith.constant 0 : index
    %c32 = arith.constant 32 : index
    %4 = vector.load %arg2[%c0_0, %c32] : memref<8x96xf32, #tpu.memory_space<vmem>>, vector<8x8xf32>
    %c0_1 = arith.constant 0 : index
    %c64 = arith.constant 64 : index
    %5 = vector.load %arg2[%c0_1, %c64] : memref<8x96xf32, #tpu.memory_space<vmem>>, vector<8x8xf32>
    %cst = arith.constant dense<0.000000e+00> : vector<8x8xf32>
    %6 = tpu.matmul %3, %4, %cst {dimension_numbers = #tpu.dot_dimension_numbers<[1], [1], [0], [0], [0, 0, 1, 0], [], []>} : vector<8x8xf32>, vector<8x8xf32>, vector<8x8xf32> -> vector<8x8xf32>
    %cst_2 = arith.constant dense<0xFF800000> : vector<8xf32>
    %7 = vector.multi_reduction <maximumf>, %6, %cst_2 [1] : vector<8x8xf32> to vector<8xf32>
    %8 = vector.shape_cast %7 : vector<8xf32> to vector<8x1xf32>
    %9 = vector.broadcast %8 : vector<8x1xf32> to vector<8x8xf32>
    %10 = arith.subf %6, %9 : vector<8x8xf32>
    %11 = math.exp %10 : vector<8x8xf32>
    %cst_3 = arith.constant dense<0.000000e+00> : vector<8xf32>
    %12 = vector.multi_reduction <add>, %11, %cst_3 [1] : vector<8x8xf32> to vector<8xf32>
    %13 = vector.shape_cast %12 : vector<8xf32> to vector<8x1xf32>
    %14 = tpu.reciprocal %13 : vector<8x1xf32> -> vector<8x1xf32>
    %15 = vector.broadcast %14 : vector<8x1xf32> to vector<8x8xf32>
    %16 = arith.mulf %11, %15 : vector<8x8xf32>
    %c0_4 = arith.constant 0 : index
    %c0_5 = arith.constant 0 : index
    %c0_6 = arith.constant 0 : index
    %c0_7 = arith.constant 0 : index
    %17 = vector.load %arg3[%c0_4, %c0_5, %c0_6, %c0_7] : memref<1x4x8x8xf32, #tpu.memory_space<vmem>>, vector<1x1x8x8xf32>
    %18 = vector.shape_cast %17 : vector<1x1x8x8xf32> to vector<8x8xf32>
    %19 = vector.shape_cast %16 : vector<8x8xf32> to vector<1x1x8x8xf32>
    tpu.vector_store %arg3[%c0_4, %c0_5, %c0_6, %c0_7], %19 {strides = array<i32>} : memref<1x4x8x8xf32, #tpu.memory_space<vmem>>, vector<1x1x8x8xf32>,
    %cst_8 = arith.constant dense<0.000000e+00> : vector<8x8xf32>
    %20 = tpu.matmul %16, %5, %cst_8 {dimension_numbers = #tpu.dot_dimension_numbers<[1], [0], [0], [1], [0, 0, 1, 1], [], []>} : vector<8x8xf32>, vector<8x8xf32>, vector<8x8xf32> -> vector<8x8xf32>
    %21 = arith.index_cast %1 : i32 to index
    %c8 = arith.constant 8 : index
    %22 = vector.load %arg2[%21, %c8] : memref<8x96xf32, #tpu.memory_space<vmem>>, vector<8x8xf32>
    %c0_9 = arith.constant 0 : index
    %c40 = arith.constant 40 : index
    %23 = vector.load %arg2[%c0_9, %c40] : memref<8x96xf32, #tpu.memory_space<vmem>>, vector<8x8xf32>
    %c0_10 = arith.constant 0 : index
    %c72 = arith.constant 72 : index
    %24 = vector.load %arg2[%c0_10, %c72] : memref<8x96xf32, #tpu.memory_space<vmem>>, vector<8x8xf32>
    %cst_11 = arith.constant dense<0.000000e+00> : vector<8x8xf32>
    %25 = tpu.matmul %22, %23, %cst_11 {dimension_numbers = #tpu.dot_dimension_numbers<[1], [1], [0], [0], [0, 0, 1, 0], [], []>} : vector<8x8xf32>, vector<8x8xf32>, vector<8x8xf32> -> vector<8x8xf32>
    %cst_12 = arith.constant dense<0xFF800000> : vector<8xf32>
    %26 = vector.multi_reduction <maximumf>, %25, %cst_12 [1] : vector<8x8xf32> to vector<8xf32>
    %27 = vector.shape_cast %26 : vector<8xf32> to vector<8x1xf32>
    %28 = vector.broadcast %27 : vector<8x1xf32> to vector<8x8xf32>
    %29 = arith.subf %25, %28 : vector<8x8xf32>
    %30 = math.exp %29 : vector<8x8xf32>
    %cst_13 = arith.constant dense<0.000000e+00> : vector<8xf32>
    %31 = vector.multi_reduction <add>, %30, %cst_13 [1] : vector<8x8xf32> to vector<8xf32>
    %32 = vector.shape_cast %31 : vector<8xf32> to vector<8x1xf32>
    %33 = tpu.reciprocal %32 : vector<8x1xf32> -> vector<8x1xf32>
    %34 = vector.broadcast %33 : vector<8x1xf32> to vector<8x8xf32>
    %35 = arith.mulf %30, %34 : vector<8x8xf32>
    %c0_14 = arith.constant 0 : index
    %c1 = arith.constant 1 : index
    %c0_15 = arith.constant 0 : index
    %c0_16 = arith.constant 0 : index
    %36 = vector.load %arg3[%c0_14, %c1, %c0_15, %c0_16] : memref<1x4x8x8xf32, #tpu.memory_space<vmem>>, vector<1x1x8x8xf32>
    %37 = vector.shape_cast %36 : vector<1x1x8x8xf32> to vector<8x8xf32>
    %38 = vector.shape_cast %35 : vector<8x8xf32> to vector<1x1x8x8xf32>
    tpu.vector_store %arg3[%c0_14, %c1, %c0_15, %c0_16], %38 {strides = array<i32>} : memref<1x4x8x8xf32, #tpu.memory_space<vmem>>, vector<1x1x8x8xf32>,
    %cst_17 = arith.constant dense<0.000000e+00> : vector<8x8xf32>
    %39 = tpu.matmul %35, %24, %cst_17 {dimension_numbers = #tpu.dot_dimension_numbers<[1], [0], [0], [1], [0, 0, 1, 1], [], []>} : vector<8x8xf32>, vector<8x8xf32>, vector<8x8xf32> -> vector<8x8xf32>
    %40 = arith.index_cast %1 : i32 to index
    %c16 = arith.constant 16 : index
    %41 = vector.load %arg2[%40, %c16] : memref<8x96xf32, #tpu.memory_space<vmem>>, vector<8x8xf32>
    %c0_18 = arith.constant 0 : index
    %c48 = arith.constant 48 : index
    %42 = vector.load %arg2[%c0_18, %c48] : memref<8x96xf32, #tpu.memory_space<vmem>>, vector<8x8xf32>
    %c0_19 = arith.constant 0 : index
    %c80 = arith.constant 80 : index
    %43 = vector.load %arg2[%c0_19, %c80] : memref<8x96xf32, #tpu.memory_space<vmem>>, vector<8x8xf32>
    %cst_20 = arith.constant dense<0.000000e+00> : vector<8x8xf32>
    %44 = tpu.matmul %41, %42, %cst_20 {dimension_numbers = #tpu.dot_dimension_numbers<[1], [1], [0], [0], [0, 0, 1, 0], [], []>} : vector<8x8xf32>, vector<8x8xf32>, vector<8x8xf32> -> vector<8x8xf32>
    %cst_21 = arith.constant dense<0xFF800000> : vector<8xf32>
    %45 = vector.multi_reduction <maximumf>, %44, %cst_21 [1] : vector<8x8xf32> to vector<8xf32>
    %46 = vector.shape_cast %45 : vector<8xf32> to vector<8x1xf32>
    %47 = vector.broadcast %46 : vector<8x1xf32> to vector<8x8xf32>
    %48 = arith.subf %44, %47 : vector<8x8xf32>
    %49 = math.exp %48 : vector<8x8xf32>
    %cst_22 = arith.constant dense<0.000000e+00> : vector<8xf32>
    %50 = vector.multi_reduction <add>, %49, %cst_22 [1] : vector<8x8xf32> to vector<8xf32>
    %51 = vector.shape_cast %50 : vector<8xf32> to vector<8x1xf32>
    %52 = tpu.reciprocal %51 : vector<8x1xf32> -> vector<8x1xf32>
    %53 = vector.broadcast %52 : vector<8x1xf32> to vector<8x8xf32>
    %54 = arith.mulf %49, %53 : vector<8x8xf32>
    %c0_23 = arith.constant 0 : index
    %c2 = arith.constant 2 : index
    %c0_24 = arith.constant 0 : index
    %c0_25 = arith.constant 0 : index
    %55 = vector.load %arg3[%c0_23, %c2, %c0_24, %c0_25] : memref<1x4x8x8xf32, #tpu.memory_space<vmem>>, vector<1x1x8x8xf32>
    %56 = vector.shape_cast %55 : vector<1x1x8x8xf32> to vector<8x8xf32>
    %57 = vector.shape_cast %54 : vector<8x8xf32> to vector<1x1x8x8xf32>
    tpu.vector_store %arg3[%c0_23, %c2, %c0_24, %c0_25], %57 {strides = array<i32>} : memref<1x4x8x8xf32, #tpu.memory_space<vmem>>, vector<1x1x8x8xf32>,
    %cst_26 = arith.constant dense<0.000000e+00> : vector<8x8xf32>
    %58 = tpu.matmul %54, %43, %cst_26 {dimension_numbers = #tpu.dot_dimension_numbers<[1], [0], [0], [1], [0, 0, 1, 1], [], []>} : vector<8x8xf32>, vector<8x8xf32>, vector<8x8xf32> -> vector<8x8xf32>
    %59 = arith.index_cast %1 : i32 to index
    %c24 = arith.constant 24 : index
    %60 = vector.load %arg2[%59, %c24] : memref<8x96xf32, #tpu.memory_space<vmem>>, vector<8x8xf32>
    %c0_27 = arith.constant 0 : index
    %c56 = arith.constant 56 : index
    %61 = vector.load %arg2[%c0_27, %c56] : memref<8x96xf32, #tpu.memory_space<vmem>>, vector<8x8xf32>
    %c0_28 = arith.constant 0 : index
    %c88 = arith.constant 88 : index
    %62 = vector.load %arg2[%c0_28, %c88] : memref<8x96xf32, #tpu.memory_space<vmem>>, vector<8x8xf32>
    %cst_29 = arith.constant dense<0.000000e+00> : vector<8x8xf32>
    %63 = tpu.matmul %60, %61, %cst_29 {dimension_numbers = #tpu.dot_dimension_numbers<[1], [1], [0], [0], [0, 0, 1, 0], [], []>} : vector<8x8xf32>, vector<8x8xf32>, vector<8x8xf32> -> vector<8x8xf32>
    %cst_30 = arith.constant dense<0xFF800000> : vector<8xf32>
    %64 = vector.multi_reduction <maximumf>, %63, %cst_30 [1] : vector<8x8xf32> to vector<8xf32>
    %65 = vector.shape_cast %64 : vector<8xf32> to vector<8x1xf32>
    %66 = vector.broadcast %65 : vector<8x1xf32> to vector<8x8xf32>
    %67 = arith.subf %63, %66 : vector<8x8xf32>
    %68 = math.exp %67 : vector<8x8xf32>
    %cst_31 = arith.constant dense<0.000000e+00> : vector<8xf32>
    %69 = vector.multi_reduction <add>, %68, %cst_31 [1] : vector<8x8xf32> to vector<8xf32>
    %70 = vector.shape_cast %69 : vector<8xf32> to vector<8x1xf32>
    %71 = tpu.reciprocal %70 : vector<8x1xf32> -> vector<8x1xf32>
    %72 = vector.broadcast %71 : vector<8x1xf32> to vector<8x8xf32>
    %73 = arith.mulf %68, %72 : vector<8x8xf32>
    %c0_32 = arith.constant 0 : index
    %c3 = arith.constant 3 : index
    %c0_33 = arith.constant 0 : index
    %c0_34 = arith.constant 0 : index
    %74 = vector.load %arg3[%c0_32, %c3, %c0_33, %c0_34] : memref<1x4x8x8xf32, #tpu.memory_space<vmem>>, vector<1x1x8x8xf32>
    %75 = vector.shape_cast %74 : vector<1x1x8x8xf32> to vector<8x8xf32>
    %76 = vector.shape_cast %73 : vector<8x8xf32> to vector<1x1x8x8xf32>
    tpu.vector_store %arg3[%c0_32, %c3, %c0_33, %c0_34], %76 {strides = array<i32>} : memref<1x4x8x8xf32, #tpu.memory_space<vmem>>, vector<1x1x8x8xf32>,
    %cst_35 = arith.constant dense<0.000000e+00> : vector<8x8xf32>
    %77 = tpu.matmul %73, %62, %cst_35 {dimension_numbers = #tpu.dot_dimension_numbers<[1], [0], [0], [1], [0, 0, 1, 1], [], []>} : vector<8x8xf32>, vector<8x8xf32>, vector<8x8xf32> -> vector<8x8xf32>
    %78 = tpu.concatenate %20, %39, %58, %77 in 1 : vector<8x8xf32>, vector<8x8xf32>, vector<8x8xf32>, vector<8x8xf32> -> vector<8x32xf32>
    %c0_36 = arith.constant 0 : index
    %c0_37 = arith.constant 0 : index
    %79 = vector.load %arg4[%c0_36, %c0_37] : memref<8x32xf32, #tpu.memory_space<vmem>>, vector<8x32xf32>
    tpu.vector_store %arg4[%c0_36, %c0_37], %78 {strides = array<i32>} : memref<8x32xf32, #tpu.memory_space<vmem>>, vector<8x32xf32>,
    return
  }
  func.func @transform_0(%arg0: i32, %arg1: i32) -> (i32, i32) {
    %c0_i32 = arith.constant 0 : i32
    %c0_i32_0 = arith.constant 0 : i32
    return %arg0, %c0_i32 : i32, i32
  }
  func.func @transform_1(%arg0: i32, %arg1: i32) -> (i32, i32, i32, i32) {
    %c0_i32 = arith.constant 0 : i32
    %c0_i32_0 = arith.constant 0 : i32
    %c0_i32_1 = arith.constant 0 : i32
    return %arg0, %c0_i32, %arg1, %c0_i32_0 : i32, i32, i32, i32
  }
  func.func @transform_2(%arg0: i32, %arg1: i32) -> (i32, i32) {
    %c1_i32 = arith.constant 1 : i32
    %0 = arith.muli %arg0, %c1_i32 : i32
    %1 = arith.addi %0, %arg1 : i32
    %c0_i32 = arith.constant 0 : i32
    %c0_i32_0 = arith.constant 0 : i32
    return %1, %c0_i32 : i32, i32
  }
}

</mosaic_0001>

<bundles_post_ra>
// kernel: multi_head_attention_forward.5
= control target key start
LH: loop header
LB: loop body
LE: loop exit
PB: predicated region body
PF: predicated region fallthrough
CT: control target
= control target key end

     0   :  { %vm19_vm0 = vcmask 261120   ;;  %v194_v3 = vmov 0.0   ;;  %s250_s0 = inlined_call_operand.vmem [shape: f32[16,32], index: 0, kind: input, shape index: {}]   ;;  %s251_s1 = inlined_call_operand.vmem [shape: f32[32,32], index: 1, kind: input, shape index: {}]   ;;  %s252_s2 = inlined_call_operand.vmem [shape: f32[1,32], index: 2, kind: input, shape index: {}]   ;;  %s253_s3 = inlined_call_operand.hbm [shape: f32[16,32], index: 3, kind: output, shape index: {}]  }
   0x1   :  { %v29_v0 = vld [vmem:[%s251_s1 + $0x18] sm:$0xff]  ;;  %v28_v1 = vld [vmem:[%s251_s1 + $0x10] sm:$0xff]  ;;  %v24_v2 = vld [vmem:[%s250_s0] sm:$0xff]  ;;  %21 = vst.msk [vmem:[#allocation2 + $0x8] sm:$0xff] %vm19_vm0, %v194_v3 }
   0x2   :  { %157 = vmatprep.subr.mxu0 %v29_v0  ;;  %20 = vst.msk [vmem:[#allocation2] sm:$0xff] %vm19_vm0, %v194_v3  ;;  %v27_v4 = vld [vmem:[%s251_s1 + $0x8] sm:$0xff]  ;;  %165 = vmatprep.mubr.msk.f32.mxu0 %vm19_vm0, %v24_v2 }
   0x3   :  { %158 = vmatpush3.msra.mxu0 %v29_v0 }
   0x4   :  { %8 = vsyncpa [#allocation4], 0  ;;  %159 = vmatprep.subr.mxu0 %v28_v1  ;;  %v26_v5 = vld [vmem:[%s251_s1] sm:$0xff]  ;;  %v25_v6 = vld [vmem:[%s250_s0 + $0x8] sm:$0xff]  ;;  %s195_s25 = smov [#allocation3]  }
   0x5   :  { %160 = vmatpush3.msra.mxu0 %v28_v1  ;;  %v150_v13 = vld [vmem:[%s252_s2] ss:$0 sm:$0xff]  ;;  %s137_s0 = sshll.u32 %s195_s25, 4  ;;  %s138_s0 = int_to_ptr.vmem [resolvable:$true] %s137_s0 }
   0x6   :  { %161 = vmatprep.subr.mxu0 %v27_v4  ;;  %s172_s26 = scalar_lea.vmem %s138_s0, 256  ;;  %p177_p1 = scmp.lt.s32.totalorder %s138_s0, %s138_s0 }
   0x7   :  { %162 = vmatpush3.msra.mxu0 %v27_v4  ;;  %p173_p0 = scmp.ne.s32.totalorder %s138_s0, %s172_s26  ;;  %p178_p2 = scmp.lt.s32.totalorder %s172_s26, %s172_s26 }
   0x8   :  { %163 = vmatprep.subr.mxu0 %v26_v5  ;;  %v23_v7 = vld [vmem:[#allocation2 + $0x8] sm:$0xff] }
   0x9   :  { %164 = vmatpush3.msra.mxu0 %v26_v5  ;;  %v22_v9 = vld [vmem:[#allocation2] sm:$0xff]  ;;  %p179_p3 = por %p178_p2, %p177_p1 }
   0xa   :  { %166 = vmatmul.mubr.msk.f32.vlgmr.msra.gmra.mxu0 %vm19_vm0, %v25_v6 }
   0xb   :  { %p180_p4 = pnand %p179_p3, %p173_p0 }
  0xca   :  { %v167_v8 = vpop.f32.mrf.mxu0 }
  0xcb   :  { %v113_v10 = vadd.f32 %v167_v8, %v23_v7 }
  0xcc   :  { %v103_v11 = vpop.f32.mrf.mxu0 }
  0xcd   :  { %115 = vst.msk [vmem:[#allocation2 + $0x8] sm:$0xff] %vm19_vm0, %v113_v10  ;;  %v112_v12 = vadd.f32 %v103_v11, %v22_v9 }
  0xcf   :  { %114 = vst.msk [vmem:[#allocation2] sm:$0xff] %vm19_vm0, %v112_v12 }
  0xd4   :  { %v120_v14 = vld [vmem:[#allocation2 + $0x8] sm:$0xff] }
  0xd5   :  { %v129_v15 = vadd.f32 %v150_v13, %v120_v14 }
  0xd6   :  { %v119_v16 = vld [vmem:[#allocation2] sm:$0xff] }
  0xd7   :  { %v128_v17 = vadd.f32 %v150_v13, %v119_v16  ;;  %131 = vst.msk [vmem:[#allocation3 + $0x8] sm:$0xff] %vm19_vm0, %v129_v15 }
  0xd9   :  { %130 = vst.msk [vmem:[#allocation3] sm:$0xff] %vm19_vm0, %v128_v17 }
  0xda   :  { %183 = shalt.err (!%p180_p4)
}
  0xdb   :  { %s196_s27 = smov 128   ;;  %s197_s2 = smov 8  }
  0xdc   :  { %143 = dma.vmem_to_hbm [thread:$0]  %s138_s0, 256, %s253_s3, [#allocation4], %s196_s27, %s196_s27, %s197_s2  }
  0xdd   :  { %192 = dma.done.wait [#allocation4], 256  }
  0xde   :  { %193 = vsyncadd [#allocation4], 4294967040 }
  0xdf   :  { %147 = vsyncpa [#allocation4], 1 }

// kernel: multi_head_attention_forward.3
= control target key start
LH: loop header
LB: loop body
LE: loop exit
PB: predicated region body
PF: predicated region fallthrough
CT: control target
= control target key end

     0   :  { %8 = vsyncpa [#allocation4], 0  ;;  %s283_s0 = inlined_call_operand.hbm [shape: f32[16,32], index: 0, kind: input, shape index: {}]   ;;  %s284_s1 = inlined_call_operand.hbm [shape: f32[32,96], index: 1, kind: input, shape index: {}]   ;;  %s285_s2 = inlined_call_operand.vmem [shape: f32[1,96], index: 2, kind: input, shape index: {}]   ;;  %s286_s3 = inlined_call_operand.vmem [shape: f32[16,96], index: 3, kind: output, shape index: {}]  }
   0x1   :  { %9 = vsyncpa [#allocation6], 0  ;;  %s235_s12 = smov [#allocation3]  }
   0x2   :  { %s15_s13 = sshll.u32 %s235_s12, 4  ;;  %s16_s13 = int_to_ptr.vmem [resolvable:$true] %s15_s13 }
   0x3   :  { %s199_s14 = scalar_lea.vmem %s16_s13, 256  ;;  %p204_p1 = scmp.lt.s32.totalorder %s16_s13, %s16_s13 }
   0x4   :  { %p200_p0 = scmp.ne.s32.totalorder %s16_s13, %s199_s14  ;;  %p205_p2 = scmp.lt.s32.totalorder %s199_s14, %s199_s14 }
   0x6   :  { %p206_p3 = por %p205_p2, %p204_p1 }
   0x8   :  { %p207_p4 = pnand %p206_p3, %p200_p0 }
   0xa   :  { %210 = shalt.err (!%p207_p4)
}
   0xb   :  { %s236_s15 = smov 128   ;;  %s237_s16 = smov 8  }
   0xc   :  { %21 = dma.hbm_to_vmem [thread:$0]  %s283_s0, 256, %s16_s13, [#allocation4], %s236_s15, %s236_s15, %s237_s16  }
   0xd   :  { %s238_s19 = smov [#allocation5]  }
   0xe   :  { %s27_s20 = sshll.u32 %s238_s19, 4  ;;  %s28_s20 = int_to_ptr.vmem [resolvable:$true] %s27_s20 }
   0xf   :  { %s219_s21 = scalar_lea.vmem %s28_s20, 512  ;;  %p224_p6 = scmp.lt.s32.totalorder %s28_s20, %s28_s20 }
  0x10   :  { %p220_p5 = scmp.ne.s32.totalorder %s28_s20, %s219_s21  ;;  %p225_p7 = scmp.lt.s32.totalorder %s219_s21, %s219_s21 }
  0x12   :  { %p226_p8 = por %p225_p7, %p224_p6 }
  0x14   :  { %p227_p9 = pnand %p226_p8, %p220_p5 }
  0x16   :  { %230 = shalt.err (!%p227_p9)
}
  0x17   :  { %33 = dma.hbm_to_vmem [thread:$0]  %s284_s1, 512, %s28_s20, [#allocation6], %s236_s15, %s236_s15, %s237_s16  }
  0x18   :  { %231 = dma.done.wait [#allocation4], 256  }
  0x19   :  { %232 = vsyncadd [#allocation4], 4294967040 }
  0x1a   :  { %233 = dma.done.wait [#allocation6], 512  }
  0x1b   :  { %234 = vsyncadd [#allocation6], 4294966784  ;;  %vm46_vm0 = vcmask 785408   ;;  %v239_v0 = vmov 0.0   ;;  %vm57_vm1 = vcmask 261120   ;;  %v56_v1 = vld [vmem:[#allocation5 + $0x18] sm:$0xff] }
  0x1c   :  { %48 = vst.msk [vmem:[#allocation2 + $0x8] sm:$0xff] %vm46_vm0, %v239_v0  ;;  %47 = vst.msk [vmem:[#allocation2] sm:$0xff] %vm46_vm0, %v239_v0  ;;  %v55_v2 = vld [vmem:[#allocation5 + $0x10] sm:$0xff]  ;;  %175 = vmatprep.subr.mxu0 %v56_v1  ;;  %v54_v4 = vld [vmem:[#allocation5 + $0x8] sm:$0xff] }
  0x1d   :  { %v51_v3 = vld [vmem:[#allocation3] sm:$0xff]  ;;  %176 = vmatpush3.msra.mxu0 %v56_v1  ;;  %v53_v5 = vld [vmem:[#allocation5] sm:$0xff]  ;;  %v52_v6 = vld [vmem:[#allocation3 + $0x8] sm:$0xff] }
  0x1e   :  { %183 = vmatprep.mubr.msk.f32.mxu0 %vm57_vm1, %v51_v3  ;;  %177 = vmatprep.subr.mxu0 %v55_v2  ;;  %v168_v13 = vld [vmem:[%s285_s2] ss:$0 sm:$0xff] }
  0x1f   :  { %178 = vmatpush3.msra.mxu0 %v55_v2 }
  0x20   :  { %179 = vmatprep.subr.mxu0 %v54_v4 }
  0x21   :  { %180 = vmatpush3.msra.mxu0 %v54_v4 }
  0x22   :  { %181 = vmatprep.subr.mxu0 %v53_v5 }
  0x23   :  { %182 = vmatpush3.msra.mxu0 %v53_v5  ;;  %v50_v7 = vld [vmem:[#allocation2 + $0x8] sm:$0xff]  ;;  %v49_v9 = vld [vmem:[#allocation2] sm:$0xff] }
  0x24   :  { %184 = vmatmul.mubr.msk.f32.vlgmr.msra.gmra.mxu0 %vm57_vm1, %v52_v6 }
  0xe4   :  { %v185_v8 = vpop.f32.mrf.mxu0 }
  0xe5   :  { %v140_v10 = vadd.f32 %v185_v8, %v50_v7 }
  0xe6   :  { %v130_v11 = vpop.f32.mrf.mxu0 }
  0xe7   :  { %143 = vst.msk [vmem:[#allocation2 + $0x8] sm:$0xff] %vm46_vm0, %v140_v10  ;;  %v139_v12 = vadd.f32 %v130_v11, %v49_v9 }
  0xe9   :  { %142 = vst.msk [vmem:[#allocation2] sm:$0xff] %vm46_vm0, %v139_v12 }
  0xee   :  { %v148_v14 = vld [vmem:[#allocation2 + $0x8] sm:$0xff] }
  0xef   :  { %v157_v15 = vadd.f32 %v168_v13, %v148_v14 }
  0xf0   :  { %v147_v16 = vld [vmem:[#allocation2] sm:$0xff] }
  0xf1   :  { %159 = vst.msk [vmem:[%s286_s3 + $0x8] sm:$0xff] %vm46_vm0, %v157_v15  ;;  %v156_v17 = vadd.f32 %v168_v13, %v147_v16 }
  0xf3   :  { %158 = vst.msk [vmem:[%s286_s3] sm:$0xff] %vm46_vm0, %v156_v17 }
  0xf4   :  { %164 = vsyncpa [#allocation4], 1 }
  0xf5   :  { %165 = vsyncpa [#allocation6], 1 }

// kernel: multi_head_attention_forward.4
= control target key start
LH: loop header
LB: loop body
LE: loop exit
PB: predicated region body
PF: predicated region fallthrough
CT: control target
= control target key end

     0   :  { %8 = vsyncpa [#allocation3], 0  ;;  %s1480_s0 = inlined_call_operand.vmem [shape: f32[16,96], index: 0, kind: input, shape index: {}]   ;;  %s1481_s1 = inlined_call_operand.hbm [shape: f32[2,4,8,8], index: 1, kind: output, shape index: {0}]   ;;  %s1482_s2 = inlined_call_operand.vmem [shape: f32[16,32], index: 2, kind: output, shape index: {1}]  }
   0x1   :  { %10 = vsyncpa [#allocation3 + $0x1], 0  ;;  %s1279_s9 = smov 0   ;;  %s1281_s10 = smov 0  }
   0x2   :  { %s1283_s11 = smov 0   ;;  %s1285_s12 = smov 0  }
   0x3   :  { %s1287_s13 = smov 0   ;;  %s1289_s14 = smov 0  }
   0x4 LB: > { %s995_s15 = sadd.s32 4294967295, %s1244_s14   ;;  %s996_s16 = sadd.s32 4294967294, %s1244_s14   ;;  %s1244_s14 = sphi %s1289_s14, %s16_s14   ;;  %s1240_s13 = sphi %s1287_s13, %s1489_s13   ;;  %s1236_s12 = sphi %s1285_s12, %s1488_s12   ;;  %s1232_s11 = sphi %s1283_s11, %s1487_s11   ;;  %s1228_s10 = sphi %s1281_s10, %s1486_s10   ;;  %s1224_s9 = sphi %s1279_s9, %s1485_s9  }
   0x5   : > { %s28_s17 = sadd.s32 1, %s1240_s13  ;;  %s63_s18 = sadd.s32 1, %s1232_s11 }
   0x6   : > { %p30_p0 = scmp.ge.s32.totalorder %s28_s17, 2  ;;  %p73_p1 = scmp.ne.s32.totalorder %s1232_s11, %s1228_s10 }
   0x7   : > { %p74_p2 = scmp.eq.s32.totalorder %s995_s15, 1  ;;  %p79_p3 = scmp.ne.s32.totalorder %s1228_s10, %s1224_s9 }
   0x8   : > { %s1491_s17 = smov (%p30_p0, %s28_s17), 0  ;;  %p80_p5 = scmp.eq.s32.totalorder %s996_s16, 1 }
   0x9   : > { %p1319_p4 = por %p74_p2, %p73_p1  ;;  %s58_s20 = ssub.s32 %s1240_s13, %s1491_s17 }
   0xa   : > { %p999_p6 = scmp.ge.s32.totalorder %s1244_s14, 1  ;;  %p61_p7 = scmp.eq.s32.totalorder %s58_s20, 0 }
   0xb   : > { %p1326_p8 = por %p80_p5, %p79_p3  ;;  %p133_p9 = scmp.lt.s32.totalorder %s1244_s14, 3 }
   0xc   : > { %s1332_s22 = scalar_select %p61_p7, %s1232_s11, %s63_s18  }
   0xd   : > { %p134_p10 = pnand %p999_p6, %p133_p9 }
   0xe   : > { %p159_p11 = scmp.lt.s32.totalorder (!%p134_p10), %s1236_s12, 1  ;;  %s1248_s28 = smov (!%p134_p10), 96  }
   0xf   : > { %137 = sbr.rel (%p134_p10) target bundleno = 1475 (0x5c3), region = 24  ;;  %s1249_s29 = smov (!%p134_p10), 64  }
  0x10   : > { %s1250_s30 = smov (!%p134_p10), 88   ;;  %s1251_s3 = smov (!%p134_p10), 120  }
  0x11   : > { %s1252_s4 = smov (!%p134_p10), 80   ;;  %s1253_s5 = smov (!%p134_p10), 72  }
  0x12   : > { %s1254_s6 = smov (!%p134_p10), 112   ;;  %s1255_s7 = smov (!%p134_p10), 104  }
  0x13   : > { %s149_s8 = sand.u32 (!%p134_p10), 1, %s1228_s10   ;;  %s1256_s18 = smov (!%p134_p10), 56  }
  0x14   : > { %v1246_v0 = vmov 0.0   ;;  %vm1247_vm0 = vmmov 0   ;;  %s1339_s23 = scalar_select %p159_p11, %s1236_s12, 1  ;;  %vm176_vm1 = vcmask 64512  }
  0x15   : > { %1040 = vmatprep.subr.mxu0 %v1246_v0  ;;  %1042 = vmatprep.mubr.msk.f32.mxu0 %vm1247_vm0, %v1246_v0  ;;  %s1000_s15 = sshll.u32 %s149_s8, 5  ;;  %s1257_s20 = smov 40  }
  0x16   : > { %1045 = vmatprep.subr.mxu1 %v1246_v0  ;;  %1047 = vmatprep.mubr.msk.f32.mxu1 %vm1247_vm0, %v1246_v0  ;;  %s1001_s24 = sshll.u32 %s1339_s23, 3  ;;  %s1372_s16 = scalar_lea.vmem [#allocation2], %s1000_s15 }
  0x17   : > { %s162_s27 = scalar_lea.vmem %s1480_s0, %s1001_s24  ;;  %s1258_s25 = smov 48  }
  0x18   : > { %v1350_v1 = vld [vmem:[%s162_s27] sm:$0xff]  ;;  %s1023_s26 = sshll.u32 %s1236_s12, 9  ;;  %s892_s27 = sshll.u32 %s1372_s16, 4  ;;  %s1424_s27 = int_to_ptr.vmem [resolvable:$true] %s892_s27 }
  0x19   : > { %174 = vrot.lane.b32.xlu0 %v1350_v1, %s1248_s28  ;;  %264 = vrot.lane.b32.xlu1 %v1350_v1, %s1249_s29  ;;  %s1259_s12 = smov [#allocation2]  }
  0x1d   : > { %346 = vrot.lane.b32.xlu1 %v1350_v1, %s1250_s30  ;;  %s1422_s30 = scalar_lea.hbm %s1481_s1, %s1023_s26 }
  0x21   : > { %343 = vrot.lane.b32.xlu1 %v1350_v1, %s1251_s3  ;;  %s1428_s3 = scalar_lea.sflag [#allocation3], %s149_s8 }
  0x25   : > { %517 = vrot.lane.b32.xlu1 %v1350_v1, %s1252_s4  ;;  %s1168_s4 = scalar_lea.vmem %s1424_s27, 512 }
  0x26   : > { %p1169_p12 = scmp.ne.s32.totalorder %s1424_s27, %s1168_s4 }
  0x28   : > { %p1170_p13 = pnand %p1169_p12, %p1319_p4 }
  0x2a   : > { %p1171_p0 = pneg %p1170_p13 }
  0x8b   : > { %v175_v2 = vpop.permute.xlu0 %174  ;;  %v265_v6 = vpop.permute.xlu1 %264 }
  0x8c   : > { %1041 = vmatpush3.xpose.msk.msra.mxu0 %vm176_vm1, %v175_v2  ;;  %1046 = vmatpush3.msra.mxu1 %v265_v6 }
  0x8d   : > { %1055 = vmatprep.subr.mxu0 %v1246_v0  ;;  %1050 = vmatprep.subr.mxu1 %v1246_v0 }
  0x8f   : > { %1043 = vmatmul.mubr.msk.f32.vlgmr.msra.gmra.mxu0 %vm176_vm1, %v1350_v1  ;;  %v347_v12 = vpop.permute.xlu1 %346 }
  0x90   : > { %1057 = vmatprep.mubr.msk.f32.mxu0 %vm1247_vm0, %v1246_v0 }
  0x93   : > { %v344_v13 = vpop.permute.xlu1 %343 }
  0x97   : > { %v518_v14 = vpop.permute.xlu1 %517 }
 0x14f   : > { %v248_v3 = vpop.f32.mrf.mxu0 }
 0x150   : > { %v252_v4 = vsel %vm176_vm1, %v248_v3, -inf }
 0x151   : > { %253 = vmax.xlane.f32.xlu0 %v252_v4  ;;  %v1044_v5 = vpop.f32.mrf.mxu0 }
 0x167   : > { %688 = vrot.lane.b32.xlu0 %v1350_v1, %s1253_s5  ;;  %s1172_s5 = sshll.u32 %s1259_s12, 4  ;;  %s1173_s5 = int_to_ptr.vmem [resolvable:$false] %s1172_s5 }
 0x168   : > { %p1175_p1 = scmp.lt.s32.totalorder %s1424_s27, %s1173_s5 }
 0x1da   : > { %v254_v7 = vpop.xlane.xlu0 %253 }
 0x1db   : > { %v255_v8 = vsub.f32 %v248_v3, %v254_v7 }
 0x1dd   : > { %v256_v9 = vmul.f32 1.442695, %v255_v8 }
 0x1de   : > { %v689_v19 = vpop.permute.xlu0 %688 }
 0x1df   : > { %1152 = vpow2.f32 %v256_v9 }
 0x1ec   : > { %v1153_v10 = vpop.eup %1152 }
 0x1ed   : > { %v258_v11 = vsel %vm176_vm1, %v1153_v10, 0.0 }
 0x1ee   : > { %259 = vadd.xlane.f32.xlu1 %v258_v11 }
 0x1ff   : > { %514 = vrot.lane.b32.xlu1 %v1350_v1, %s1254_s6  ;;  %s1174_s6 = scalar_lea.vmem %s1173_s5, 1024 }
 0x200   : > { %p1176_p2 = scmp.lt.s32.totalorder %s1174_s6, %s1168_s4 }
 0x202   : > { %p1177_p3 = por %p1176_p2, %p1175_p1 }
 0x203   : > { %685 = vrot.lane.b32.xlu1 %v1350_v1, %s1255_s7 }
 0x204   : > { %p1178_p5 = pnand %p1177_p3, %p1171_p0 }
 0x277   : > { %v260_v15 = vpop.xlane.xlu1 %259 }
 0x278   : > { %1154 = vrcp.f32 %v260_v15 }
 0x27b   : > { %v515_v18 = vpop.permute.xlu1 %514 }
 0x27f   : > { %v686_v20 = vpop.permute.xlu1 %685 }
 0x285   : > { %v1155_v16 = vpop.eup %1154 }
 0x286   : > { %v262_v17 = vmul.f32 %v1155_v16, %v1153_v10 }
 0x288   : > { %263 = vst.msk [vmem:[%s1372_s16] sm:$0xff] %vm176_vm1, %v262_v17  ;;  %1048 = vmatmul.mubr.msk.f32.vlgmr.msra.gmra.mxu1 %vm176_vm1, %v262_v17 }
 0x289   : > { %1051 = vmatpush3.xpose.msk.msra.mxu1 %vm176_vm1, %v347_v12  ;;  %1052 = vmatprep.mubr.msk.f32.mxu1 %vm1247_vm0, %v1246_v0 }
 0x28a   : > { %1060 = vmatprep.subr.mxu1 %v1246_v0 }
 0x28c   : > { %1053 = vmatmul.mubr.msk.f32.vlgmr.msra.gmra.mxu1 %vm176_vm1, %v344_v13 }
 0x28d   : > { %1061 = vmatpush3.xpose.msk.msra.mxu1 %vm176_vm1, %v518_v14  ;;  %1062 = vmatprep.mubr.msk.f32.mxu1 %vm1247_vm0, %v1246_v0 }
 0x28e   : > { %1070 = vmatprep.subr.mxu1 %v1246_v0 }
 0x290   : > { %1063 = vmatmul.mubr.msk.f32.vlgmr.msra.gmra.mxu1 %vm176_vm1, %v515_v18 }
 0x291   : > { %1071 = vmatpush3.xpose.msk.msra.mxu1 %vm176_vm1, %v689_v19  ;;  %1072 = vmatprep.mubr.msk.f32.mxu1 %vm1247_vm0, %v1246_v0 }
 0x294   : > { %1073 = vmatmul.mubr.msk.f32.vlgmr.msra.gmra.mxu1 %vm176_vm1, %v686_v20 }
 0x348   : > { %v1391_v21 = vpop.f32.mrf.mxu1 }
 0x34a   : > { %v1049_v22 = vpop.f32.mrf.mxu1 }
 0x34c   : > { %v418_v23 = vpop.f32.mrf.mxu1 }
 0x34d   : > { %v422_v24 = vsel %vm176_vm1, %v418_v23, -inf }
 0x34e   : > { %423 = vmax.xlane.f32.xlu1 %v422_v24  ;;  %v1054_v25 = vpop.f32.mrf.mxu1 }
 0x350   : > { %v589_v26 = vpop.f32.mrf.mxu1 }
 0x351   : > { %v593_v27 = vsel %vm176_vm1, %v589_v26, -inf }
 0x352   : > { %594 = vmax.xlane.f32.xlu0 %v593_v27  ;;  %v1064_v28 = vpop.f32.mrf.mxu1 }
 0x354   : > { %v760_v29 = vpop.f32.mrf.mxu1 }
 0x355   : > { %v764_v30 = vsel %vm176_vm1, %v760_v29, -inf }
 0x356   : > { %765 = vmax.xlane.f32.xlu1 %v764_v30  ;;  %v1074_v31 = vpop.f32.mrf.mxu1 }
 0x367   : > { %435 = vrot.lane.b32.xlu1 %v1350_v1, %s1256_s18 }
 0x3d7   : > { %v424_v32 = vpop.xlane.xlu1 %423 }
 0x3d8   : > { %v425_v33 = vsub.f32 %v418_v23, %v424_v32 }
 0x3da   : > { %v426_v34 = vmul.f32 1.442695, %v425_v33 }
 0x3db   : > { %v595_v35 = vpop.xlane.xlu0 %594 }
 0x3dc   : > { %1156 = vpow2.f32 %v426_v34  ;;  %v596_v36 = vsub.f32 %v589_v26, %v595_v35 }
 0x3de   : > { %v597_v37 = vmul.f32 1.442695, %v596_v36 }
 0x3df   : > { %v766_v38 = vpop.xlane.xlu1 %765 }
 0x3e0   : > { %1158 = vpow2.f32 %v597_v37  ;;  %v767_v39 = vsub.f32 %v760_v29, %v766_v38 }
 0x3e2   : > { %v768_v40 = vmul.f32 1.442695, %v767_v39 }
 0x3e3   : > { %v436_v41 = vpop.permute.xlu1 %435 }
 0x3e4   : > { %1160 = vpow2.f32 %v768_v40  ;;  %1056 = vmatpush3.msra.mxu0 %v436_v41 }
 0x3e5   : > { %1065 = vmatprep.subr.mxu0 %v1246_v0 }
 0x3e9   : > { %v1157_v42 = vpop.eup %1156 }
 0x3ea   : > { %v428_v43 = vsel %vm176_vm1, %v1157_v42, 0.0 }
 0x3eb   : > { %429 = vadd.xlane.f32.xlu1 %v428_v43 }
 0x3ed   : > { %v1159_v44 = vpop.eup %1158 }
 0x3ee   : > { %v599_v45 = vsel %vm176_vm1, %v1159_v44, 0.0 }
 0x3ef   : > { %600 = vadd.xlane.f32.xlu1 %v599_v45 }
 0x3f1   : > { %v1161_v46 = vpop.eup %1160 }
 0x3f2   : > { %v770_v47 = vsel %vm176_vm1, %v1161_v46, 0.0 }
 0x3f3   : > { %771 = vadd.xlane.f32.xlu0 %v770_v47 }
 0x400   : > { %777 = vrot.lane.b32.xlu1 %v1350_v1, %s1257_s20 }
 0x409   : > { %606 = vrot.lane.b32.xlu0 %v1350_v1, %s1258_s25 }
 0x474   : > { %v430_v48 = vpop.xlane.xlu1 %429 }
 0x475   : > { %1162 = vrcp.f32 %v430_v48 }
 0x478   : > { %v601_v49 = vpop.xlane.xlu1 %600 }
 0x479   : > { %1164 = vrcp.f32 %v601_v49 }
 0x47c   : > { %v772_v50 = vpop.xlane.xlu0 %771  ;;  %v778_v55 = vpop.permute.xlu1 %777 }
 0x47d   : > { %1166 = vrcp.f32 %v772_v50 }
 0x480   : > { %v607_v52 = vpop.permute.xlu0 %606 }
 0x482   : > { %v1163_v51 = vpop.eup %1162 }
 0x483   : > { %v432_v53 = vmul.f32 %v1163_v51, %v1157_v42 }
 0x485   : > { %1008 = vst.msk [vmem:[%s1372_s16 + $0x8] sm:$0xff] %vm176_vm1, %v432_v53  ;;  %1058 = vmatmul.mubr.msk.f32.vlgmr.msra.gmra.mxu0 %vm176_vm1, %v432_v53 }
 0x486   : > { %v1165_v54 = vpop.eup %1164  ;;  %1066 = vmatpush3.msra.mxu0 %v607_v52  ;;  %1067 = vmatprep.mubr.msk.f32.mxu0 %vm1247_vm0, %v1246_v0 }
 0x487   : > { %1075 = vmatprep.subr.mxu0 %v1246_v0  ;;  %v603_v56 = vmul.f32 %v1165_v54, %v1159_v44 }
 0x489   : > { %1012 = vst.msk [vmem:[%s1372_s16 + $0x10] sm:$0xff] %vm176_vm1, %v603_v56  ;;  %1068 = vmatmul.mubr.msk.f32.vlgmr.msra.gmra.mxu0 %vm176_vm1, %v603_v56 }
 0x48a   : > { %v1167_v57 = vpop.eup %1166  ;;  %1076 = vmatpush3.msra.mxu0 %v778_v55  ;;  %1077 = vmatprep.mubr.msk.f32.mxu0 %vm1247_vm0, %v1246_v0 }
 0x48b   : > { %v774_v58 = vmul.f32 %v1167_v57, %v1161_v46 }
 0x48d   : > { %1016 = vst.msk [vmem:[%s1372_s16 + $0x18] sm:$0xff] %vm176_vm1, %v774_v58  ;;  %1078 = vmatmul.mubr.msk.f32.vlgmr.msra.gmra.mxu0 %vm176_vm1, %v774_v58 }
 0x48e   : > { %1181 = shalt.err (!%p1178_p5)
}
 0x48f   : > { %s1182_s7 = scalar_lea.hbm %s1422_s30, 512  ;;  %s1186_s16 = scalar_lea.hbm %s1481_s1, 1024 }
 0x490   : > { %p1183_p6 = scmp.ne.s32.totalorder %s1422_s30, %s1182_s7  ;;  %p1187_p10 = scmp.lt.s32.totalorder %s1422_s30, %s1481_s1 }
 0x491   : > { %p1188_p11 = scmp.lt.s32.totalorder %s1186_s16, %s1182_s7 }
 0x492   : > { %p1184_p7 = pnand %p1183_p6, %p1319_p4 }
 0x493   : > { %p1189_p12 = por %p1188_p11, %p1187_p10 }
 0x494   : > { %p1185_p9 = pneg %p1184_p7 }
 0x496   : > { %p1190_p13 = pnand %p1189_p12, %p1185_p9 }
 0x498   : > { %1193 = shalt.err (!%p1190_p13)
}
 0x499   : > { %s1260_s25 = smov 128   ;;  %s1261_s26 = smov 8   ;;  %vm866_vm2 = vcmask 130048   ;;  %vm868_vm3 = vcmask 195584   ;;  %vm870_vm4 = vcmask 261120  }
 0x49a   : > { %1080 = dma.vmem_to_hbm [thread:$0]  (%p1319_p4), %s1424_s27, 512, %s1422_s30, %s1428_s3, %s1260_s25, %s1260_s25, %s1261_s26  }
 0x49b   : > { %s1262_s28 = smov 16   ;;  %s1263_s29 = smov 24  }
 0x49c   : > { %s167_s30 = scalar_lea.vmem %s1482_s2, %s1001_s24 }
 0x545   : > { %v507_v59 = vpop.f32.mrf.mxu0 }
 0x546   : > { %854 = vrot.lane.b32.xlu1 %v507_v59, %s1261_s26 }
 0x547   : > { %v1059_v60 = vpop.f32.mrf.mxu0 }
 0x549   : > { %v678_v61 = vpop.f32.mrf.mxu0 }
 0x54a   : > { %858 = vrot.lane.b32.xlu0 %v678_v61, %s1262_s28 }
 0x54b   : > { %v1069_v62 = vpop.f32.mrf.mxu0 }
 0x54d   : > { %v849_v63 = vpop.f32.mrf.mxu0 }
 0x54e   : > { %862 = vrot.lane.b32.xlu1 %v849_v63, %s1263_s29 }
 0x54f   : > { %v1079_v0 = vpop.f32.mrf.mxu0 }
 0x5b8   : > { %v855_v1 = vpop.permute.xlu1 %854 }
 0x5b9   : > { %v865_v3 = vsel %vm176_vm1, %v1391_v21, %v855_v1 }
 0x5bc   : > { %v859_v2 = vpop.permute.xlu0 %858 }
 0x5bd   : > { %v867_v4 = vsel %vm866_vm2, %v865_v3, %v859_v2 }
 0x5c0   : > { %v863_v5 = vpop.permute.xlu1 %862 }
 0x5c1   : > { %v869_v6 = vsel %vm868_vm3, %v867_v4, %v863_v5 }
 0x5c2   : > { %871 = vst.msk [vmem:[%s167_s30] sm:$0xff] %vm870_vm4, %v869_v6 }
 0x5c3 PF: > { %p1086_p4 = scmp.ge.s32.totalorder %s1244_s14, 2  ;;  %s911_s3 = sand.u32 1, %s1224_s9  }
 0x5c4   : > { %s912_s4 = scalar_lea.sflag [#allocation3], %s911_s3 }
 0x5c5   : > { %p1083_p0 = pnand %p1086_p4, %p1326_p8 }
 0x5c7   : > { %p1084_p1 = pneg %p1083_p0 }
 0x5c9   : > { %1219 = dma.done.wait (%p1084_p1), %s912_s4, 512  }
 0x5ca   : > { %1221 = vsyncadd (%p1084_p1), %s912_s4, 4294966784  ;;  %s16_s14 = sadd.s32 1, %s1244_s14   ;;  %s1485_s9 = smov %s1228_s10 }
 0x5cb   : > { %p13_p2 = scmp.ge.s32.totalorder %s16_s14, 4   ;;  %s1486_s10 = smov %s1232_s11 }
 0x5cc   : > { %s1487_s11 = smov %s1332_s22  ;;  %s1488_s12 = smov %s1240_s13 }
 0x5cd   : > { %s1489_s13 = smov %s1491_s17  ;;  %15 = sbr.rel (!%p13_p2) target bundleno = 4 (0x4), region = 75 }
 0x5d2   :  { %925 = vsyncpa [#allocation3], 1 }
 0x5d3   :  { %927 = vsyncpa [#allocation3 + $0x1], 1 }

</bundles_post_ra>
